<compile_context>
chip_gen: v7x
topology: tpu7x:2x2x1
jax: 0.10.0
libtpu: 0.0.40
codegen_flags: <defaults>
</compile_context>

<pallas_src>
import functools

import numpy as np
import jax
import jax.numpy as jnp
from jax.experimental import pallas as pl
from jax.experimental.pallas import tpu as pltpu


# ----------------------------------------------------------------------------
# Fused Pallas kernel: one batch element per grid step
# ----------------------------------------------------------------------------
def dense_layer_kernel(x_ref, w1_ref, b1_ref, w2_ref, b2_ref, mask_ref,
                       poolt_ref, out_ref, *, H, W, HID):
    n = H * W

    # ---- conv1 (1x1, BN1 folded) + ReLU: (HID, C_in) @ (C_in, H*W) ---------
    x = x_ref[0]                                              # (C_in, H*W)
    y1 = jnp.dot(w1_ref[...], x, preferred_element_type=jnp.float32)
    y1 = jnp.maximum(y1 + b1_ref[...], 0.0)                   # (HID, H*W)

    # ---- conv2 (3x3, pad=1, BN2 folded): 9 lane-rolled, edge-masked taps ---
    # stacked along the contraction axis -> ONE (HID,9*HID)@(9*HID,H*W) matmul
    taps = []
    for kh in range(3):
        for kw in range(3):
            t = kh * 3 + kw
            s = (kh - 1) * W + (kw - 1)          # flat pixel offset of the tap
            if s == 0:
                taps.append(y1)                  # center tap: no shift, no mask
            else:
                tap = pltpu.roll(y1, (-s) % n, 1)        # tap[:, p] = y1[:, p+s]
                taps.append(tap * mask_ref[t:t + 1, :])  # zero out-of-image px
    taps = jnp.concatenate(taps, axis=0)                  # (9*HID, H*W)
    y2 = jnp.dot(w2_ref[...], taps, preferred_element_type=jnp.float32)
    y2 = jnp.maximum(y2 + b2_ref[...], 0.0)               # (HID, H*W)

    # TODO(synk): nn.Dropout is identity in eval mode; training-mode
    # stochastic masking (pltpu.prng_*) is not implemented here.

    # ---- AdaptiveAvgPool2d((2,4)) as one pooling-matrix matmul --------------
    out_ref[0] = jnp.dot(y2, poolt_ref[...],
                         preferred_element_type=jnp.float32)  # (HID, PH*PW)


# ----------------------------------------------------------------------------
# Wrapper / host-side glue
# ----------------------------------------------------------------------------
def fold_conv1_bn(w, b, gamma, beta, mean, var, eps):
    """1x1 conv (torch OIHW) + inference BN -> (HID, C_in) weight, (HID,1) bias."""
    scale = gamma / jnp.sqrt(var + eps)
    w_f = w[:, :, 0, 0] * scale[:, None]                     # (HID, C_in)
    b_f = ((b - mean) * scale + beta).reshape(-1, 1)         # (HID, 1)
    return w_f, b_f


def fold_conv2_bn(w, b, gamma, beta, mean, var, eps):
    """3x3 conv (torch OIHW) + inference BN -> (HID, 9*HID) weight (tap-major,
    channel-minor columns matching the kernel's tap stacking), (HID,1) bias."""
    c_out, c_in, kh, kw = w.shape
    scale = gamma / jnp.sqrt(var + eps)
    w_f = jnp.transpose(w, (0, 2, 3, 1)).reshape(c_out, kh * kw * c_in)
    w_f = w_f * scale[:, None]                                # (HID, 9*C_in)
    b_f = ((b - mean) * scale + beta).reshape(-1, 1)          # (HID, 1)
    return w_f, b_f


def make_tap_masks(H, W):
    """(9, H*W) validity masks for the 3x3 taps (pad=1)."""
    M = np.zeros((9, H * W), np.float32)
    for kh in range(3):
        for kw in range(3):
            t = kh * 3 + kw
            for h in range(H):
                for w in range(W):
                    hh, ww = h + kh - 1, w + kw - 1
                    if 0 <= hh < H and 0 <= ww < W:
                        M[t, h * W + w] = 1.0
    return jnp.asarray(M)


def make_pool_matrix_t(H, W, ph, pw):
    # TODO(synk): general AdaptiveAvgPool2d bin boundaries for non-divisible
    # H/W are not handled; H=16,W=16 -> (2,4) is plain uniform pooling.
    assert H % ph == 0 and W % pw == 0
    bh, bw = H // ph, W // pw
    P = np.zeros((H * W, ph * pw), np.float32)
    inv = 1.0 / (bh * bw)
    for oh in range(ph):
        for ow in range(pw):
            for h in range(oh * bh, (oh + 1) * bh):
                for w in range(ow * bw, (ow + 1) * bw):
                    P[h * W + w, oh * pw + ow] = inv
    return jnp.asarray(P)


def dense_layer_forward(x_nchw, w1f, b1f, w2f, b2f, mask, poolt,
                        *, pool_hw=(2, 4)):
    """x_nchw: (B, C_in, H, W) -> (B, HID, 2, 4)  (same as the PyTorch module)."""
    B, C_in, H, W = x_nchw.shape
    HID = w1f.shape[0]
    PH, PW = pool_hw
    n = H * W

    # NCHW -> (B, C_in, H*W): channels on sublanes, pixels on lanes (pure reshape).
    x_t = x_nchw.reshape(B, C_in, n)

    kern = functools.partial(dense_layer_kernel, H=H, W=W, HID=HID)
    out = pl.pallas_call(
        kern,
        out_shape=jax.ShapeDtypeStruct((B, HID, PH * PW), jnp.float32),
        grid=(B,),
        in_specs=[
            pl.BlockSpec((1, C_in, n), lambda b: (b, 0, 0)),   # x (per batch)
            pl.BlockSpec((HID, C_in), lambda b: (0, 0)),       # w1 (resident)
            pl.BlockSpec((HID, 1), lambda b: (0, 0)),          # b1
            pl.BlockSpec((HID, 9 * HID), lambda b: (0, 0)),    # w2
            pl.BlockSpec((HID, 1), lambda b: (0, 0)),          # b2
            pl.BlockSpec((9, n), lambda b: (0, 0)),            # tap masks
            pl.BlockSpec((n, PH * PW), lambda b: (0, 0)),      # pooling matrix
        ],
        out_specs=pl.BlockSpec((1, HID, PH * PW), lambda b: (b, 0, 0)),
        compiler_params=pltpu.CompilerParams(
            dimension_semantics=("parallel",)),
    )(x_t, w1f, b1f, w2f, b2f, mask, poolt)

    # (B, HID, PH*PW) -> (B, HID, PH, PW) : pure reshape, matches NCHW output.
    return out.reshape(B, HID, PH, PW)


# ----------------------------------------------------------------------------
# Pure-JAX reference (exact PyTorch eval-mode semantics)
# ----------------------------------------------------------------------------
def _ref_forward(x, w1, b1, g1, be1, m1, v1, w2, b2, g2, be2, m2, v2, eps):
    dn = ("NCHW", "OIHW", "NCHW")
    hp = jax.lax.Precision.HIGHEST
    y = jax.lax.conv_general_dilated(x, w1, (1, 1), "VALID",
                                     dimension_numbers=dn, precision=hp)
    y = y + b1[None, :, None, None]
    y = (g1[None, :, None, None] * (y - m1[None, :, None, None])
         / jnp.sqrt(v1 + eps)[None, :, None, None] + be1[None, :, None, None])
    y = jnp.maximum(y, 0.0)
    y = jax.lax.conv_general_dilated(y, w2, (1, 1), ((1, 1), (1, 1)),
                                     dimension_numbers=dn, precision=hp)
    y = y + b2[None, :, None, None]
    y = (g2[None, :, None, None] * (y - m2[None, :, None, None])
         / jnp.sqrt(v2 + eps)[None, :, None, None] + be2[None, :, None, None])
    y = jnp.maximum(y, 0.0)
    B, C, H, W = y.shape
    y = y.reshape(B, C, 2, H // 2, 4, W // 4).mean(axis=(3, 5))
    return y


# ----------------------------------------------------------------------------
if __name__ == "__main__":
    B, C_IN, HID = 2, 4, 32
    H = W = 16
    EPS = 1e-5

    key = jax.random.PRNGKey(0)
    ks = jax.random.split(key, 13)

    x = jax.random.normal(ks[0], (B, C_IN, H, W), dtype=jnp.float32)

    w1 = 0.2 * jax.random.normal(ks[1], (HID, C_IN, 1, 1), dtype=jnp.float32)
    b1 = 0.1 * jax.random.normal(ks[2], (HID,), dtype=jnp.float32)
    g1 = 1.0 + 0.1 * jax.random.normal(ks[3], (HID,), dtype=jnp.float32)
    be1 = 0.1 * jax.random.normal(ks[4], (HID,), dtype=jnp.float32)
    m1 = 0.1 * jax.random.normal(ks[5], (HID,), dtype=jnp.float32)
    v1 = jax.random.uniform(ks[6], (HID,), minval=0.5, maxval=1.5,
                            dtype=jnp.float32)

    w2 = 0.05 * jax.random.normal(ks[7], (HID, HID, 3, 3), dtype=jnp.float32)
    b2 = 0.1 * jax.random.normal(ks[8], (HID,), dtype=jnp.float32)
    g2 = 1.0 + 0.1 * jax.random.normal(ks[9], (HID,), dtype=jnp.float32)
    be2 = 0.1 * jax.random.normal(ks[10], (HID,), dtype=jnp.float32)
    m2 = 0.1 * jax.random.normal(ks[11], (HID,), dtype=jnp.float32)
    v2 = jax.random.uniform(ks[12], (HID,), minval=0.5, maxval=1.5,
                            dtype=jnp.float32)

    # Fold conv+BN once in the wrapper (pure glue); precompute masks & pooling.
    w1f, b1f = fold_conv1_bn(w1, b1, g1, be1, m1, v1, EPS)   # (HID,C_IN),(HID,1)
    w2f, b2f = fold_conv2_bn(w2, b2, g2, be2, m2, v2, EPS)   # (HID,9*HID),(HID,1)
    mask = make_tap_masks(H, W)                              # (9, H*W)
    poolt = make_pool_matrix_t(H, W, 2, 4)                   # (H*W, 8)

    out = dense_layer_forward(x, w1f, b1f, w2f, b2f, mask, poolt)
    out = jax.block_until_ready(out)

    ref = _ref_forward(x, w1, b1, g1, be1, m1, v1,
                       w2, b2, g2, be2, m2, v2, EPS)

    assert out.shape == (B, HID, 2, 4), out.shape
    assert jnp.allclose(out, ref, rtol=1e-3, atol=1e-3), (
        float(jnp.max(jnp.abs(out - ref))))

    print("KERNEL_OK")
</pallas_src>

<mosaic_0001>
module attributes {stable_mosaic.version = 11 : i64} {
  func.func @dense_layer_kernel(%arg0: i32, %arg1: memref<1x4x256xf32, #tpu.memory_space<vmem>>, %arg2: memref<32x4xf32, #tpu.memory_space<vmem>>, %arg3: memref<32x1xf32, #tpu.memory_space<vmem>>, %arg4: memref<32x288xf32, #tpu.memory_space<vmem>>, %arg5: memref<32x1xf32, #tpu.memory_space<vmem>>, %arg6: memref<9x256xf32, #tpu.memory_space<vmem>>, %arg7: memref<256x8xf32, #tpu.memory_space<vmem>>, %arg8: memref<1x32x8xf32, #tpu.memory_space<vmem>>) attributes {dimension_semantics = [#tpu.dimension_semantics<parallel>], iteration_bounds = array<i64: 2>, scalar_prefetch = 0 : i64, scratch_operands = 0 : i64, tpu.core_type = #tpu.core_type<tc>, window_params = [{transform_indices = @transform_0, window_bounds = array<i64: 1, 4, 256>}, {pipeline_mode = #tpu.pipeline_mode<synchronous>, transform_indices = @transform_1, window_bounds = array<i64: 32, 4>}, {pipeline_mode = #tpu.pipeline_mode<synchronous>, transform_indices = @transform_2, window_bounds = array<i64: 32, 1>}, {pipeline_mode = #tpu.pipeline_mode<synchronous>, transform_indices = @transform_3, window_bounds = array<i64: 32, 288>}, {pipeline_mode = #tpu.pipeline_mode<synchronous>, transform_indices = @transform_4, window_bounds = array<i64: 32, 1>}, {pipeline_mode = #tpu.pipeline_mode<synchronous>, transform_indices = @transform_5, window_bounds = array<i64: 9, 256>}, {pipeline_mode = #tpu.pipeline_mode<synchronous>, transform_indices = @transform_6, window_bounds = array<i64: 256, 8>}, {transform_indices = @transform_7, window_bounds = array<i64: 1, 32, 8>}]} {
    %c0 = arith.constant 0 : index
    %c0_0 = arith.constant 0 : index
    %c0_1 = arith.constant 0 : index
    %0 = vector.load %arg1[%c0, %c0_0, %c0_1] : memref<1x4x256xf32, #tpu.memory_space<vmem>>, vector<1x4x256xf32>
    %1 = vector.shape_cast %0 : vector<1x4x256xf32> to vector<4x256xf32>
    %c0_2 = arith.constant 0 : index
    %c0_3 = arith.constant 0 : index
    %2 = vector.load %arg2[%c0_2, %c0_3] : memref<32x4xf32, #tpu.memory_space<vmem>>, vector<32x4xf32>
    %cst = arith.constant dense<0.000000e+00> : vector<32x256xf32>
    %3 = tpu.matmul %2, %1, %cst {dimension_numbers = #tpu.dot_dimension_numbers<[1], [0], [0], [1], [0, 0, 1, 1], [], []>} : vector<32x4xf32>, vector<4x256xf32>, vector<32x256xf32> -> vector<32x256xf32>
    %c0_4 = arith.constant 0 : index
    %c0_5 = arith.constant 0 : index
    %4 = vector.load %arg3[%c0_4, %c0_5] : memref<32x1xf32, #tpu.memory_space<vmem>>, vector<32x1xf32>
    %5 = vector.broadcast %4 : vector<32x1xf32> to vector<32x256xf32>
    %6 = arith.addf %3, %5 : vector<32x256xf32>
    %cst_6 = arith.constant 0.000000e+00 : f32
    %7 = vector.broadcast %cst_6 : f32 to vector<32x256xf32>
    %8 = arith.maximumf %6, %7 : vector<32x256xf32>
    %c17_i32 = arith.constant 17 : i32
    %9 = tpu.dynamic_rotate %8 by %c17_i32 dim 1 : vector<32x256xf32>, i32 -> vector<32x256xf32>
    %c0_7 = arith.constant 0 : index
    %c0_8 = arith.constant 0 : index
    %10 = vector.load %arg6[%c0_7, %c0_8] : memref<9x256xf32, #tpu.memory_space<vmem>>, vector<1x256xf32>
    %11 = vector.broadcast %10 : vector<1x256xf32> to vector<32x256xf32>
    %12 = arith.mulf %9, %11 : vector<32x256xf32>
    %c16_i32 = arith.constant 16 : i32
    %13 = tpu.dynamic_rotate %8 by %c16_i32 dim 1 : vector<32x256xf32>, i32 -> vector<32x256xf32>
    %c1 = arith.constant 1 : index
    %c0_9 = arith.constant 0 : index
    %14 = vector.load %arg6[%c1, %c0_9] : memref<9x256xf32, #tpu.memory_space<vmem>>, vector<1x256xf32>
    %15 = vector.broadcast %14 : vector<1x256xf32> to vector<32x256xf32>
    %16 = arith.mulf %13, %15 : vector<32x256xf32>
    %c15_i32 = arith.constant 15 : i32
    %17 = tpu.dynamic_rotate %8 by %c15_i32 dim 1 : vector<32x256xf32>, i32 -> vector<32x256xf32>
    %c2 = arith.constant 2 : index
    %c0_10 = arith.constant 0 : index
    %18 = vector.load %arg6[%c2, %c0_10] : memref<9x256xf32, #tpu.memory_space<vmem>>, vector<1x256xf32>
    %19 = vector.broadcast %18 : vector<1x256xf32> to vector<32x256xf32>
    %20 = arith.mulf %17, %19 : vector<32x256xf32>
    %c1_i32 = arith.constant 1 : i32
    %21 = tpu.dynamic_rotate %8 by %c1_i32 dim 1 : vector<32x256xf32>, i32 -> vector<32x256xf32>
    %c3 = arith.constant 3 : index
    %c0_11 = arith.constant 0 : index
    %22 = vector.load %arg6[%c3, %c0_11] : memref<9x256xf32, #tpu.memory_space<vmem>>, vector<1x256xf32>
    %23 = vector.broadcast %22 : vector<1x256xf32> to vector<32x256xf32>
    %24 = arith.mulf %21, %23 : vector<32x256xf32>
    %c255_i32 = arith.constant 255 : i32
    %25 = tpu.dynamic_rotate %8 by %c255_i32 dim 1 : vector<32x256xf32>, i32 -> vector<32x256xf32>
    %c5 = arith.constant 5 : index
    %c0_12 = arith.constant 0 : index
    %26 = vector.load %arg6[%c5, %c0_12] : memref<9x256xf32, #tpu.memory_space<vmem>>, vector<1x256xf32>
    %27 = vector.broadcast %26 : vector<1x256xf32> to vector<32x256xf32>
    %28 = arith.mulf %25, %27 : vector<32x256xf32>
    %c241_i32 = arith.constant 241 : i32
    %29 = tpu.dynamic_rotate %8 by %c241_i32 dim 1 : vector<32x256xf32>, i32 -> vector<32x256xf32>
    %c6 = arith.constant 6 : index
    %c0_13 = arith.constant 0 : index
    %30 = vector.load %arg6[%c6, %c0_13] : memref<9x256xf32, #tpu.memory_space<vmem>>, vector<1x256xf32>
    %31 = vector.broadcast %30 : vector<1x256xf32> to vector<32x256xf32>
    %32 = arith.mulf %29, %31 : vector<32x256xf32>
    %c240_i32 = arith.constant 240 : i32
    %33 = tpu.dynamic_rotate %8 by %c240_i32 dim 1 : vector<32x256xf32>, i32 -> vector<32x256xf32>
    %c7 = arith.constant 7 : index
    %c0_14 = arith.constant 0 : index
    %34 = vector.load %arg6[%c7, %c0_14] : memref<9x256xf32, #tpu.memory_space<vmem>>, vector<1x256xf32>
    %35 = vector.broadcast %34 : vector<1x256xf32> to vector<32x256xf32>
    %36 = arith.mulf %33, %35 : vector<32x256xf32>
    %c239_i32 = arith.constant 239 : i32
    %37 = tpu.dynamic_rotate %8 by %c239_i32 dim 1 : vector<32x256xf32>, i32 -> vector<32x256xf32>
    %c8 = arith.constant 8 : index
    %c0_15 = arith.constant 0 : index
    %38 = vector.load %arg6[%c8, %c0_15] : memref<9x256xf32, #tpu.memory_space<vmem>>, vector<1x256xf32>
    %39 = vector.broadcast %38 : vector<1x256xf32> to vector<32x256xf32>
    %40 = arith.mulf %37, %39 : vector<32x256xf32>
    %41 = tpu.concatenate %12, %16, %20, %24, %8, %28, %32, %36, %40 in 0 : vector<32x256xf32>, vector<32x256xf32>, vector<32x256xf32>, vector<32x256xf32>, vector<32x256xf32>, vector<32x256xf32>, vector<32x256xf32>, vector<32x256xf32>, vector<32x256xf32> -> vector<288x256xf32>
    %c0_16 = arith.constant 0 : index
    %c0_17 = arith.constant 0 : index
    %42 = vector.load %arg4[%c0_16, %c0_17] : memref<32x288xf32, #tpu.memory_space<vmem>>, vector<32x288xf32>
    %cst_18 = arith.constant dense<0.000000e+00> : vector<32x256xf32>
    %43 = tpu.matmul %42, %41, %cst_18 {dimension_numbers = #tpu.dot_dimension_numbers<[1], [0], [0], [1], [0, 0, 1, 1], [], []>} : vector<32x288xf32>, vector<288x256xf32>, vector<32x256xf32> -> vector<32x256xf32>
    %c0_19 = arith.constant 0 : index
    %c0_20 = arith.constant 0 : index
    %44 = vector.load %arg5[%c0_19, %c0_20] : memref<32x1xf32, #tpu.memory_space<vmem>>, vector<32x1xf32>
    %45 = vector.broadcast %44 : vector<32x1xf32> to vector<32x256xf32>
    %46 = arith.addf %43, %45 : vector<32x256xf32>
    %cst_21 = arith.constant 0.000000e+00 : f32
    %47 = vector.broadcast %cst_21 : f32 to vector<32x256xf32>
    %48 = arith.maximumf %46, %47 : vector<32x256xf32>
    %c0_22 = arith.constant 0 : index
    %c0_23 = arith.constant 0 : index
    %49 = vector.load %arg7[%c0_22, %c0_23] : memref<256x8xf32, #tpu.memory_space<vmem>>, vector<256x8xf32>
    %cst_24 = arith.constant dense<0.000000e+00> : vector<32x8xf32>
    %50 = tpu.matmul %48, %49, %cst_24 {dimension_numbers = #tpu.dot_dimension_numbers<[1], [0], [0], [1], [0, 0, 1, 1], [], []>} : vector<32x256xf32>, vector<256x8xf32>, vector<32x8xf32> -> vector<32x8xf32>
    %c0_25 = arith.constant 0 : index
    %c0_26 = arith.constant 0 : index
    %c0_27 = arith.constant 0 : index
    %51 = vector.load %arg8[%c0_25, %c0_26, %c0_27] : memref<1x32x8xf32, #tpu.memory_space<vmem>>, vector<1x32x8xf32>
    %52 = vector.shape_cast %51 : vector<1x32x8xf32> to vector<32x8xf32>
    %53 = vector.shape_cast %50 : vector<32x8xf32> to vector<1x32x8xf32>
    tpu.vector_store %arg8[%c0_25, %c0_26, %c0_27], %53 {strides = array<i32>} : memref<1x32x8xf32, #tpu.memory_space<vmem>>, vector<1x32x8xf32>,
    return
  }
  func.func @transform_0(%arg0: i32) -> (i32, i32, i32) {
    %c0_i32 = arith.constant 0 : i32
    %c0_i32_0 = arith.constant 0 : i32
    %c0_i32_1 = arith.constant 0 : i32
    return %arg0, %c0_i32, %c0_i32_0 : i32, i32, i32
  }
  func.func @transform_1(%arg0: i32) -> (i32, i32) {
    %c0_i32 = arith.constant 0 : i32
    %c0_i32_0 = arith.constant 0 : i32
    %c0_i32_1 = arith.constant 0 : i32
    return %c0_i32, %c0_i32_0 : i32, i32
  }
  func.func @transform_2(%arg0: i32) -> (i32, i32) {
    %c0_i32 = arith.constant 0 : i32
    %c0_i32_0 = arith.constant 0 : i32
    %c0_i32_1 = arith.constant 0 : i32
    return %c0_i32, %c0_i32_0 : i32, i32
  }
  func.func @transform_3(%arg0: i32) -> (i32, i32) {
    %c0_i32 = arith.constant 0 : i32
    %c0_i32_0 = arith.constant 0 : i32
    %c0_i32_1 = arith.constant 0 : i32
    return %c0_i32, %c0_i32_0 : i32, i32
  }
  func.func @transform_4(%arg0: i32) -> (i32, i32) {
    %c0_i32 = arith.constant 0 : i32
    %c0_i32_0 = arith.constant 0 : i32
    %c0_i32_1 = arith.constant 0 : i32
    return %c0_i32, %c0_i32_0 : i32, i32
  }
  func.func @transform_5(%arg0: i32) -> (i32, i32) {
    %c0_i32 = arith.constant 0 : i32
    %c0_i32_0 = arith.constant 0 : i32
    %c0_i32_1 = arith.constant 0 : i32
    return %c0_i32, %c0_i32_0 : i32, i32
  }
  func.func @transform_6(%arg0: i32) -> (i32, i32) {
    %c0_i32 = arith.constant 0 : i32
    %c0_i32_0 = arith.constant 0 : i32
    %c0_i32_1 = arith.constant 0 : i32
    return %c0_i32, %c0_i32_0 : i32, i32
  }
  func.func @transform_7(%arg0: i32) -> (i32, i32, i32) {
    %c0_i32 = arith.constant 0 : i32
    %c0_i32_0 = arith.constant 0 : i32
    %c0_i32_1 = arith.constant 0 : i32
    return %arg0, %c0_i32, %c0_i32_0 : i32, i32, i32
  }
}

</mosaic_0001>

<bundles_post_ra>
// kernel: tpu_custom_call.1
= control target key start
LH: loop header
LB: loop body
LE: loop exit
PB: predicated region body
PF: predicated region fallthrough
CT: control target
= control target key end

     0   :  { %s1479_s24 = smov 0   ;;  %s2241_s0 = inlined_call_operand.vmem [shape: f32[2,4,256], index: 0, kind: input, shape index: {}]   ;;  %s2242_s1 = inlined_call_operand.vmem [shape: f32[32,4], index: 1, kind: input, shape index: {}]   ;;  %s2243_s2 = inlined_call_operand.vmem [shape: f32[32,1], index: 2, kind: input, shape index: {}]   ;;  %s2244_s3 = inlined_call_operand.vmem [shape: f32[32,288], index: 3, kind: input, shape index: {}]   ;;  %s2245_s4 = inlined_call_operand.vmem [shape: f32[32,1], index: 4, kind: input, shape index: {}]   ;;  %s2246_s5 = inlined_call_operand.vmem [shape: f32[9,256], index: 5, kind: input, shape index: {}]   ;;  %s2247_s6 = inlined_call_operand.vmem [shape: f32[256,8], index: 6, kind: input, shape index: {}]   ;;  %s2248_s7 = inlined_call_operand.vmem [shape: f32[2,32,8], index: 7, kind: output, shape index: {}]  }
   0x1 LB: > { %s1206_s25 = sadd.s32 4294967295, %s1427_s24   ;;  %p1210_p0 = scmp.ge.s32.totalorder %s1427_s24, 1  ;;  %s1427_s24 = sphi %s1479_s24, %s17_s24  }
   0x2   : > { %p237_p1 = scmp.lt.s32.totalorder %s1427_s24, 3 }
   0x4   : > { %p238_p2 = pnand %p1210_p0, %p237_p1 }
   0x6   : > { %241 = sbr.rel (%p238_p2) target bundleno = 937 (0x3a9), region = 48 }
   0xd   : > { %p269_p3 = scmp.lt.s32.totalorder %s1206_s25, 1  ;;  %v2249_v0 = vmov 0.0   ;;  %v284_v1 = vld [vmem:[%s2243_s2] sm:$0xff]  ;;  %v1430_v2 = vmov 0   ;;  %v286_v3 = vld [vmem:[%s2243_s2 + $0x10] sm:$0xff]  ;;  %v285_v4 = vld [vmem:[%s2243_s2 + $0x8] sm:$0xff]  ;;  %v441_v49 = vlaneseq }
   0xe   : > { %392 = vmatprep.mubr.f32.mxu0 %v2249_v0  ;;  %1418 = vset.pattern.permute.xlu0 %v1430_v2  ;;  %v287_v5 = vld [vmem:[%s2243_s2 + $0x18] sm:$0xff]  ;;  %vm323_vm0 = vcmask 1043456   ;;  %v280_v8 = vld [vmem:[%s2242_s1] sm:$0xff]  ;;  %vm310_vm1 = vcmask 31744   ;;  %v281_v9 = vld [vmem:[%s2242_s1 + $0x8] sm:$0xff]  ;;  %s1431_s23 = smov 17  }
   0xf   : > { %s2263_s25 = smov (!%p269_p3, %s1206_s25), 1  ;;  %1419 = vset.pattern.permute.xlu1 %v1430_v2  ;;  %290 = vperm.xlu0 %1418, %v284_v1   ;;  %v282_v10 = vld [vmem:[%s2242_s1 + $0x10] sm:$0xff]  ;;  %v283_v11 = vld [vmem:[%s2242_s1 + $0x18] sm:$0xff]  ;;  %s1432_s26 = smov 16   ;;  %v795_v43 = vld [vmem:[%s2244_s3 + $0x8] sm:$0xff]  ;;  %v455_v54 = vshrl.u32 %v441_v49, 7 }
  0x10   : > { %300 = vperm.xlu1 %1419, %v286_v3   ;;  %s1234_s30 = sshll.u32 %s2263_s25, 3  ;;  %s1433_s27 = smov 15   ;;  %907 = vmatprep.mubr.f32.mxu1 %v795_v43  ;;  %v806_v46 = vld [vmem:[%s2245_s4] sm:$0xff]  ;;  %v807_v50 = vld [vmem:[%s2245_s4 + $0x8] sm:$0xff]  ;;  %v808_v51 = vld [vmem:[%s2245_s4 + $0x10] sm:$0xff]  ;;  %v1679_v58 = vand.u32 127, %v441_v49 }
  0x11   : > { %s273_s14 = scalar_lea.vmem %s2241_s0, %s1234_s30  ;;  %s1434_s28 = smov 1   ;;  %v809_v55 = vld [vmem:[%s2245_s4 + $0x18] sm:$0xff]  ;;  %v1681_v59 = vsub.s32 0, %v455_v54  ;;  %v1683_v60 = vsub.s32 1, %v455_v54  ;;  %vm830_vm10 = vcmask 261120   ;;  %vm1146_vm11 = vcmask 64512  }
  0x12   : > { %v279_v6 = vld [vmem:[%s273_s14] sm:$0xff]  ;;  %s1435_s29 = smov 127   ;;  %s1436_s30 = smov 113   ;;  %vm443_vm2 = vcmp.lt.s32.totalorder %v1679_v58, 17  ;;  %vm488_vm3 = vcmp.lt.s32.totalorder %v1679_v58, 16  ;;  %vm534_vm4 = vcmp.lt.s32.totalorder %v1679_v58, 15 }
  0x13   : > { %v309_v7 = vcombine.high %v279_v6, %v279_v6  ;;  %295 = vperm.xlu0 %1418, %v285_v4   ;;  %s1437_s8 = smov 112   ;;  %s1438_s9 = smov 111   ;;  %v452_v61 = vld [vmem:[%s2246_s5] ss:$8 sm:$0x3]  ;;  %vm580_vm5 = vcmp.lt.s32.totalorder %v1679_v58, 1 }
  0x14   : > { %305 = vperm.xlu1 %1419, %v287_v5   ;;  %v1692_v1 = vrot.slane %v452_v61, %v1681_v59  ;;  %v1697_v2 = vld [vmem:[%s2246_s5 + $0x1] ss:$8 sm:$0x3]  ;;  %v1700_v3 = vrot.slane %v452_v61, %v1683_v60  ;;  %vm626_vm6 = vcmp.lt.s32.totalorder %v1679_v58, 127  ;;  %vm672_vm7 = vcmp.lt.s32.totalorder %v1679_v58, 113  ;;  %s1235_s17 = sshll.u32 %s2263_s25, 5 }
  0x15   : > { %1215 = vmatprep.subr.msk.mxu0 %vm323_vm0, %v309_v7  ;;  %vm764_vm8 = vcmp.lt.s32.totalorder %v1679_v58, 111  ;;  %vm718_vm9 = vcmp.lt.s32.totalorder %v1679_v58, 112  ;;  %v794_v58 = vld [vmem:[%s2244_s3] sm:$0xff]  ;;  %s278_s20 = scalar_lea.vmem %s2248_s7, %s1235_s17 }
  0x16   : > { %1216 = vmatpush1.msk.msra.mxu0 %vm323_vm0, %v279_v6 }
  0x17   : > { %1217 = vmatmul.mubr.msk.f32.vlgmr.msra.gmra.mrb[0].mxu0 %vm310_vm1, %v280_v8 }
  0x18   : > { %398 = vmatprep.mubr.f32.mxu0 %v2249_v0 }
  0x1b   : > { %1218 = vmatmul.mubr.msk.f32.gmra.mrb[2].mxu0 %vm310_vm1, %v281_v9 }
  0x1c   : > { %404 = vmatprep.mubr.f32.mxu0 %v2249_v0 }
  0x1f   : > { %1219 = vmatmul.mubr.msk.f32.gmra.mrb[4].mxu0 %vm310_vm1, %v282_v10  ;;  %v1715_v10 = vrot.slane %v1697_v2, %v1681_v59 }
  0x20   : > { %410 = vmatprep.mubr.f32.mxu0 %v2249_v0 }
  0x23   : > { %1220 = vmatmul.mubr.msk.f32.gmra.mrb[6].mxu0 %vm310_vm1, %v283_v11 }
  0x24   : > { %996 = vmatprep.mubr.f32.mxu0 %v2249_v0 }
  0x8e   : > { %v291_v12 = vpop.permute.xlu0 %290 }
  0x8f   : > { %v301_v30 = vpop.permute.xlu1 %300 }
  0x92   : > { %v296_v17 = vpop.permute.xlu0 %295 }
  0x93   : > { %v306_v32 = vpop.permute.xlu1 %305 }
  0xea   : > { %v394_v13 = vpop.f32.mrb[0].mxu0 }
  0xeb   : > { %v395_v14 = vadd.f32 %v394_v13, %v291_v12  ;;  %v396_v15 = vpop.f32.mrb[1].mxu0 }
  0xec   : > { %v397_v26 = vadd.f32 %v396_v15, %v291_v12 }
  0xed   : > { %v1522_v16 = vmax.f32 %v395_v14, 0.0 }
  0xee   : > { %v400_v18 = vpop.f32.mrb[2].mxu0  ;;  %v1548_v27 = vmax.f32 %v397_v26, 0.0 }
  0xef   : > { %v401_v19 = vadd.f32 %v400_v18, %v296_v17  ;;  %v402_v20 = vpop.f32.mrb[3].mxu0  ;;  %425 = vrot.lane.b32.xlu0 %v1522_v16, %s1431_s23 }
  0xf0   : > { %v403_v28 = vadd.f32 %v402_v20, %v296_v17  ;;  %v1222_v17 = vld [vmem:[%s2246_s5 + $0x2] ss:$8 sm:$0x3] }
  0xf1   : > { %v1526_v21 = vmax.f32 %v401_v19, 0.0 }
  0xf2   : > { %v406_v22 = vpop.f32.mrb[4].mxu0  ;;  %v1554_v29 = vmax.f32 %v403_v28, 0.0  ;;  %v1745_v28 = vrot.slane %v1222_v17, %v1681_v59 }
  0xf3   : > { %427 = vrot.lane.b32.xlu1 %v1526_v21, %s1431_s23  ;;  %472 = vrot.lane.b32.xlu0 %v1522_v16, %s1432_s26  ;;  %v408_v23 = vpop.f32.mrb[5].mxu0  ;;  %v407_v31 = vadd.f32 %v406_v22, %v301_v30 }
  0xf4   : > { %v409_v36 = vadd.f32 %v408_v23, %v301_v30  ;;  %v1748_v30 = vrot.slane %v1222_v17, %v1683_v60 }
  0xf5   : > { %v1568_v33 = vmax.f32 %v407_v31, 0.0 }
  0xf6   : > { %v412_v24 = vpop.f32.mrb[6].mxu0  ;;  %v1596_v37 = vmax.f32 %v409_v36, 0.0 }
  0xf7   : > { %474 = vrot.lane.b32.xlu1 %v1526_v21, %s1432_s26  ;;  %518 = vrot.lane.b32.xlu0 %v1522_v16, %s1433_s27  ;;  %v414_v25 = vpop.f32.mrb[7].mxu0  ;;  %v413_v34 = vadd.f32 %v412_v24, %v306_v32  ;;  %v1223_v24 = vld [vmem:[%s2246_s5 + $0x3] ss:$8 sm:$0x3] }
  0xf8   : > { %v415_v38 = vadd.f32 %v414_v25, %v306_v32  ;;  %v1756_v36 = vrot.slane %v1223_v24, %v1681_v59 }
  0xf9   : > { %v1578_v35 = vmax.f32 %v413_v34, 0.0 }
  0xfa   : > { %v1602_v39 = vmax.f32 %v415_v38, 0.0 }
  0xfb   : > { %520 = vrot.lane.b32.xlu1 %v1526_v21, %s1433_s27  ;;  %564 = vrot.lane.b32.xlu0 %v1522_v16, %s1434_s28 }
  0xff   : > { %566 = vrot.lane.b32.xlu1 %v1526_v21, %s1434_s28  ;;  %610 = vrot.lane.b32.xlu0 %v1522_v16, %s1435_s29 }
 0x103   : > { %612 = vrot.lane.b32.xlu1 %v1526_v21, %s1435_s29  ;;  %656 = vrot.lane.b32.xlu0 %v1522_v16, %s1436_s30 }
 0x107   : > { %658 = vrot.lane.b32.xlu1 %v1526_v21, %s1436_s30  ;;  %433 = vrot.lane.b32.xlu0 %v1548_v27, %s1431_s23 }
 0x10b   : > { %435 = vrot.lane.b32.xlu1 %v1554_v29, %s1431_s23  ;;  %480 = vrot.lane.b32.xlu0 %v1548_v27, %s1432_s26 }
 0x10f   : > { %482 = vrot.lane.b32.xlu1 %v1554_v29, %s1432_s26  ;;  %526 = vrot.lane.b32.xlu0 %v1548_v27, %s1433_s27 }
 0x113   : > { %528 = vrot.lane.b32.xlu1 %v1554_v29, %s1433_s27  ;;  %572 = vrot.lane.b32.xlu0 %v1548_v27, %s1434_s28 }
 0x117   : > { %574 = vrot.lane.b32.xlu1 %v1554_v29, %s1434_s28  ;;  %618 = vrot.lane.b32.xlu0 %v1548_v27, %s1435_s29 }
 0x11b   : > { %620 = vrot.lane.b32.xlu1 %v1554_v29, %s1435_s29  ;;  %429 = vrot.lane.b32.xlu0 %v1568_v33, %s1431_s23 }
 0x11f   : > { %431 = vrot.lane.b32.xlu1 %v1578_v35, %s1431_s23  ;;  %476 = vrot.lane.b32.xlu0 %v1568_v33, %s1432_s26 }
 0x123   : > { %478 = vrot.lane.b32.xlu1 %v1578_v35, %s1432_s26  ;;  %522 = vrot.lane.b32.xlu0 %v1568_v33, %s1433_s27 }
 0x127   : > { %524 = vrot.lane.b32.xlu1 %v1578_v35, %s1433_s27  ;;  %568 = vrot.lane.b32.xlu0 %v1568_v33, %s1434_s28 }
 0x12b   : > { %570 = vrot.lane.b32.xlu1 %v1578_v35, %s1434_s28  ;;  %614 = vrot.lane.b32.xlu0 %v1568_v33, %s1435_s29 }
 0x12f   : > { %616 = vrot.lane.b32.xlu1 %v1578_v35, %s1435_s29  ;;  %437 = vrot.lane.b32.xlu0 %v1596_v37, %s1431_s23 }
 0x133   : > { %439 = vrot.lane.b32.xlu1 %v1602_v39, %s1431_s23  ;;  %664 = vrot.lane.b32.xlu0 %v1548_v27, %s1436_s30 }
 0x137   : > { %666 = vrot.lane.b32.xlu1 %v1554_v29, %s1436_s30  ;;  %484 = vrot.lane.b32.xlu0 %v1596_v37, %s1432_s26 }
 0x13b   : > { %486 = vrot.lane.b32.xlu1 %v1602_v39, %s1432_s26  ;;  %530 = vrot.lane.b32.xlu0 %v1596_v37, %s1433_s27 }
 0x13f   : > { %662 = vrot.lane.b32.xlu1 %v1578_v35, %s1436_s30  ;;  %576 = vrot.lane.b32.xlu0 %v1596_v37, %s1434_s28 }
 0x143   : > { %532 = vrot.lane.b32.xlu1 %v1602_v39, %s1433_s27  ;;  %622 = vrot.lane.b32.xlu0 %v1596_v37, %s1435_s29 }
 0x147   : > { %704 = vrot.lane.b32.xlu1 %v1526_v21, %s1437_s8  ;;  %660 = vrot.lane.b32.xlu0 %v1568_v33, %s1436_s30 }
 0x14b   : > { %578 = vrot.lane.b32.xlu1 %v1602_v39, %s1434_s28  ;;  %668 = vrot.lane.b32.xlu0 %v1596_v37, %s1436_s30 }
 0x14f   : > { %712 = vrot.lane.b32.xlu1 %v1554_v29, %s1437_s8  ;;  %702 = vrot.lane.b32.xlu0 %v1522_v16, %s1437_s8 }
 0x153   : > { %750 = vrot.lane.b32.xlu1 %v1526_v21, %s1438_s9  ;;  %710 = vrot.lane.b32.xlu0 %v1548_v27, %s1437_s8 }
 0x157   : > { %758 = vrot.lane.b32.xlu1 %v1554_v29, %s1438_s9  ;;  %748 = vrot.lane.b32.xlu0 %v1522_v16, %s1438_s9 }
 0x15b   : > { %624 = vrot.lane.b32.xlu1 %v1602_v39, %s1435_s29  ;;  %756 = vrot.lane.b32.xlu0 %v1548_v27, %s1438_s9 }
 0x15f   : > { %708 = vrot.lane.b32.xlu1 %v1578_v35, %s1437_s8  ;;  %706 = vrot.lane.b32.xlu0 %v1568_v33, %s1437_s8 }
 0x161   : > { %v426_v40 = vpop.permute.xlu0 %425 }
 0x163   : > { %670 = vrot.lane.b32.xlu1 %v1602_v39, %s1436_s30  ;;  %714 = vrot.lane.b32.xlu0 %v1596_v37, %s1437_s8 }
 0x165   : > { %v428_v41 = vpop.permute.xlu1 %427  ;;  %v1645_v42 = vpop.permute.xlu0 %472 }
 0x167   : > { %754 = vrot.lane.b32.xlu1 %v1578_v35, %s1438_s9  ;;  %752 = vrot.lane.b32.xlu0 %v1568_v33, %s1438_s9 }
 0x169   : > { %v1652_v44 = vpop.permute.xlu1 %474  ;;  %v519_v45 = vpop.permute.xlu0 %518 }
 0x16b   : > { %716 = vrot.lane.b32.xlu1 %v1602_v39, %s1437_s8  ;;  %760 = vrot.lane.b32.xlu0 %v1596_v37, %s1438_s9 }
 0x16d   : > { %v521_v47 = vpop.permute.xlu1 %520  ;;  %v1659_v48 = vpop.permute.xlu0 %564 }
 0x16f   : > { %762 = vrot.lane.b32.xlu1 %v1602_v39, %s1438_s9  ;;  %812 = vperm.xlu0 %1418, %v806_v46   ;;  %v1765_v46 = vrot.slane %v1223_v24, %v1683_v60 }
 0x171   : > { %v1668_v52 = vpop.permute.xlu1 %566  ;;  %v1670_v53 = vpop.permute.xlu0 %610 }
 0x173   : > { %817 = vperm.xlu1 %1419, %v807_v50   ;;  %822 = vperm.xlu0 %1418, %v808_v51  }
 0x175   : > { %v1675_v56 = vpop.permute.xlu1 %612  ;;  %v1677_v57 = vpop.permute.xlu0 %656 }
 0x177   : > { %827 = vperm.xlu1 %1419, %v809_v55  }
 0x179   : > { %v1688_v62 = vpop.permute.xlu1 %658  ;;  %v434_v63 = vpop.permute.xlu0 %433 }
 0x17a   : > { %v444_v4 = vsel %vm443_vm2, %v426_v40, %v434_v63  ;;  %v448_v5 = vsel %vm443_vm2, %v434_v63, %v426_v40 }
 0x17b   : > { %v464_v11 = vmul.f32 %v1692_v1, %v448_v5  ;;  %v465_v13 = vmul.f32 %v1700_v3, %v444_v4 }
 0x17d   : > { %v436_v6 = vpop.permute.xlu1 %435  ;;  %v1707_v7 = vpop.permute.xlu0 %480 }
 0x17e   : > { %v445_v8 = vsel %vm443_vm2, %v428_v41, %v436_v6  ;;  %v449_v9 = vsel %vm443_vm2, %v436_v6, %v428_v41  ;;  %v493_v15 = vsel %vm488_vm3, %v1707_v7, %v1645_v42 }
 0x17f   : > { %v466_v12 = vmul.f32 %v1692_v1, %v449_v9  ;;  %v467_v14 = vmul.f32 %v1700_v3, %v445_v8  ;;  %v1739_v25 = vmul.f32 %v1715_v10, %v493_v15 }
 0x181   : > { %v1728_v18 = vpop.permute.xlu1 %482  ;;  %v527_v19 = vpop.permute.xlu0 %526  ;;  %v1280_v20 = vpack.c.bf16 %v467_v14, %v465_v13  ;;  %v1282_v22 = vpack.c.bf16 %v466_v12, %v464_v11 }
 0x182   : > { %v494_v23 = vsel %vm488_vm3, %v1728_v18, %v1652_v44  ;;  %v535_v31 = vsel %vm534_vm4, %v519_v45, %v527_v19  ;;  %v539_v32 = vsel %vm534_vm4, %v527_v19, %v519_v45  ;;  %v1224_v45 = vld [vmem:[%s2246_s5 + $0x5] ss:$8 sm:$0x3] }
 0x183   : > { %v1742_v26 = vmul.f32 %v1715_v10, %v494_v23  ;;  %1281 = vmatprep.subr.bf16.mxu1 %v1280_v20  ;;  %v1772_v49 = vmul.f32 %v1745_v28, %v539_v32  ;;  %v1775_v50 = vmul.f32 %v1748_v30, %v535_v31  ;;  %v1790_v63 = vrot.slane %v1224_v45, %v1681_v59 }
 0x184   : > { %1283 = vmatpush1.bf16.msra.mxu1 %v1282_v22 }
 0x185   : > { %v529_v34 = vpop.permute.xlu1 %528  ;;  %v573_v38 = vpop.permute.xlu0 %572 }
 0x186   : > { %v536_v41 = vsel %vm534_vm4, %v521_v47, %v529_v34  ;;  %v540_v43 = vsel %vm534_vm4, %v529_v34, %v521_v47  ;;  %v581_v54 = vsel %vm580_vm5, %v1659_v48, %v573_v38  ;;  %v585_v55 = vsel %vm580_vm5, %v573_v38, %v1659_v48 }
 0x187   : > { %v1778_v51 = vmul.f32 %v1745_v28, %v540_v43  ;;  %v1781_v47 = vmul.f32 %v1748_v30, %v536_v41  ;;  %v1803_v48 = vrot.slane %v1224_v45, %v1683_v60  ;;  %v1809_v12 = vmul.f32 %v1756_v36, %v585_v55 }
 0x188   : > { %v1812_v13 = vmul.f32 %v1765_v46, %v581_v54 }
 0x189   : > { %v575_v61 = vpop.permute.xlu1 %574  ;;  %v619_v4 = vpop.permute.xlu0 %618 }
 0x18a   : > { %v582_v8 = vsel %vm580_vm5, %v1668_v52, %v575_v61  ;;  %v586_v9 = vsel %vm580_vm5, %v575_v61, %v1668_v52  ;;  %v627_v11 = vsel %vm626_vm6, %v1670_v53, %v619_v4  ;;  %v631_v52 = vsel %vm626_vm6, %v619_v4, %v1670_v53 }
 0x18b   : > { %v1815_v14 = vmul.f32 %v1756_v36, %v586_v9  ;;  %v1818_v15 = vmul.f32 %v1765_v46, %v582_v8  ;;  %v1834_v31 = vmul.f32 %v1790_v63, %v627_v11  ;;  %v1837_v53 = vmul.f32 %v1803_v48, %v631_v52  ;;  %v1225_v52 = vld [vmem:[%s2246_s5 + $0x6] ss:$8 sm:$0x3] }
 0x18c   : > { %v1878_v22 = vrot.slane %v1225_v52, %v1681_v59 }
 0x18d   : > { %v621_v17 = vpop.permute.xlu1 %620  ;;  %v430_v19 = vpop.permute.xlu0 %429  ;;  %2252 = vst [vmem:[#allocation2_spill] sm:$0xff] %v1834_v31 }
 0x18e   : > { %v628_v23 = vsel %vm626_vm6, %v1675_v56, %v621_v17  ;;  %v632_v24 = vsel %vm626_vm6, %v621_v17, %v1675_v56  ;;  %v490_v17 = vsel %vm488_vm3, %v1652_v44, %v1728_v18  ;;  %v489_v56 = vsel %vm488_vm3, %v1645_v42, %v1707_v7 }
 0x18f   : > { %v1840_v32 = vmul.f32 %v1790_v63, %v628_v23  ;;  %v1843_v34 = vmul.f32 %v1803_v48, %v632_v24  ;;  %v507_v23 = vrot.slane %v1697_v2, %v1683_v60 }
 0x191   : > { %v432_v38 = vpop.permute.xlu1 %431  ;;  %v477_v41 = vpop.permute.xlu0 %476  ;;  %v513_v18 = vmul.f32 %v507_v23, %v490_v17  ;;  %v511_v5 = vmul.f32 %v507_v23, %v489_v56 }
 0x195   : > { %v479_v45 = vpop.permute.xlu1 %478  ;;  %v523_v54 = vpop.permute.xlu0 %522 }
 0x199   : > { %v1849_v55 = vpop.permute.xlu1 %524  ;;  %v1851_v61 = vpop.permute.xlu0 %568 }
 0x19d   : > { %v1853_v4 = vpop.permute.xlu1 %570  ;;  %v1855_v8 = vpop.permute.xlu0 %614 }
 0x1a1   : > { %v1857_v9 = vpop.permute.xlu1 %616  ;;  %v438_v11 = vpop.permute.xlu0 %437 }
 0x1a2   : > { %v446_v24 = vsel %vm443_vm2, %v430_v19, %v438_v11  ;;  %v450_v0 = vsel %vm443_vm2, %v438_v11, %v430_v19  ;;  %v1885_v19 = vrot.slane %v1225_v52, %v1683_v60 }
 0x1a3   : > { %v468_v11 = vmul.f32 %v1692_v1, %v450_v0  ;;  %v469_v42 = vmul.f32 %v1700_v3, %v446_v24 }
 0x1a5   : > { %v440_v43 = vpop.permute.xlu1 %439  ;;  %v665_v44 = vpop.permute.xlu0 %664 }
 0x1a6   : > { %v447_v2 = vsel %vm443_vm2, %v432_v38, %v440_v43  ;;  %v451_v20 = vsel %vm443_vm2, %v440_v43, %v432_v38  ;;  %v673_v17 = vsel %vm672_vm7, %v1677_v57, %v665_v44  ;;  %v677_v38 = vsel %vm672_vm7, %v665_v44, %v1677_v57 }
 0x1a7   : > { %v470_v7 = vmul.f32 %v1692_v1, %v451_v20  ;;  %v471_v6 = vmul.f32 %v1700_v3, %v447_v2  ;;  %v1288_v3 = vpack.c.bf16 %v513_v18, %v511_v5  ;;  %v1904_v20 = vmul.f32 %v1878_v22, %v673_v17 }
 0x1a8   : > { %v1907_v56 = vmul.f32 %v1885_v19, %v677_v38  ;;  %v2253_v17 = vpack.c.bf16 %v1742_v26, %v1739_v25 }
 0x1a9   : > { %v667_v43 = vpop.permute.xlu1 %666  ;;  %v485_v52 = vpop.permute.xlu0 %484  ;;  %v1284_v40 = vpack.c.bf16 %v471_v6, %v469_v42  ;;  %v1286_v31 = vpack.c.bf16 %v470_v7, %v468_v11 }
 0x1aa   : > { %v674_v0 = vsel %vm672_vm7, %v1688_v62, %v667_v43  ;;  %v678_v1 = vsel %vm672_vm7, %v667_v43, %v1688_v62  ;;  %v491_v24 = vsel %vm488_vm3, %v477_v41, %v485_v52  ;;  %v495_v62 = vsel %vm488_vm3, %v485_v52, %v477_v41 }
 0x1ab   : > { %v1910_v57 = vmul.f32 %v1878_v22, %v674_v0  ;;  %v1913_v6 = vmul.f32 %v1885_v19, %v678_v1  ;;  %1285 = vmatprep.subr.bf16.mxu1 %v1284_v40  ;;  %v514_v42 = vmul.f32 %v1715_v10, %v495_v62  ;;  %v515_v7 = vmul.f32 %v507_v23, %v491_v24 }
 0x1ac   : > { %1287 = vmatpush1.bf16.msra.mxu1 %v1286_v31 }
 0x1ad   : > { %v487_v5 = vpop.permute.xlu1 %486  ;;  %1289 = vmatprep.subr.bf16.mxu1 %v1288_v3  ;;  %v531_v44 = vpop.permute.xlu0 %530  ;;  %v1328_v18 = vpack.c.bf16 %v1913_v6, %v1907_v56  ;;  %v1330_v2 = vpack.c.bf16 %v1910_v57, %v1904_v20 }
 0x1ae   : > { %v492_v11 = vsel %vm488_vm3, %v479_v45, %v487_v5  ;;  %v496_v40 = vsel %vm488_vm3, %v487_v5, %v479_v45  ;;  %v537_v1 = vsel %vm534_vm4, %v523_v54, %v531_v44  ;;  %v541_v45 = vsel %vm534_vm4, %v531_v44, %v523_v54 }
 0x1af   : > { %v516_v31 = vmul.f32 %v1715_v10, %v496_v40  ;;  %v517_v41 = vmul.f32 %v507_v23, %v492_v11  ;;  %v2254_v10 = vpack.c.bf16 %v1781_v47, %v1775_v50  ;;  %v560_v24 = vmul.f32 %v1745_v28, %v541_v45 }
 0x1b0   : > { %1291 = vmatpush1.bf16.msra.mxu1 %v2253_v17  ;;  %v561_v62 = vmul.f32 %v1748_v30, %v537_v1  ;;  %v2255_v50 = vpack.c.bf16 %v1778_v51, %v1772_v49  ;;  %v2256_v49 = vpack.c.bf16 %v1818_v15, %v1812_v13  ;;  %v2257_v13 = vpack.c.bf16 %v1815_v14, %v1809_v12  ;;  %v1227_v12 = vld [vmem:[%s2246_s5 + $0x10] ss:$8 sm:$0x3] }
 0x1b1   : > { %v1932_v38 = vpop.permute.xlu1 %662  ;;  %v577_v43 = vpop.permute.xlu0 %576  ;;  %v1292_v52 = vpack.c.bf16 %v517_v41, %v515_v7  ;;  %v1294_v0 = vpack.c.bf16 %v516_v31, %v514_v42  ;;  %v1316_v14 = vpack.c.bf16 %v1602_v39, %v1596_v37  ;;  %v1995_v45 = vrot.slane %v1227_v12, %v1681_v59 }
 0x1b3   : > { %1293 = vmatprep.subr.bf16.mxu1 %v1292_v52 }
 0x1b4   : > { %1295 = vmatpush1.bf16.msra.mxu1 %v1294_v0 }
 0x1b5   : > { %v533_v3 = vpop.permute.xlu1 %532  ;;  %1297 = vmatprep.subr.bf16.mxu1 %v2254_v10  ;;  %v623_v25 = vpop.permute.xlu0 %622 }
 0x1b6   : > { %v538_v26 = vsel %vm534_vm4, %v1849_v55, %v533_v3  ;;  %v542_v23 = vsel %vm534_vm4, %v533_v3, %v1849_v55  ;;  %v583_v55 = vsel %vm580_vm5, %v1851_v61, %v577_v43  ;;  %v633_v37 = vsel %vm626_vm6, %v623_v25, %v1855_v8 }
 0x1b7   : > { %v562_v54 = vmul.f32 %v1745_v28, %v542_v23  ;;  %v563_v5 = vmul.f32 %v1748_v30, %v538_v26  ;;  %v587_v28 = vsel %vm580_vm5, %v577_v43, %v1851_v61  ;;  %v607_v41 = vmul.f32 %v1765_v46, %v583_v55  ;;  %v2259_v55 = vld [vmem:[#allocation2_spill] sm:$0xff] }
 0x1b8   : > { %1299 = vmatpush1.bf16.msra.mxu1 %v2255_v50  ;;  %v606_v31 = vmul.f32 %v1756_v36, %v587_v28  ;;  %v653_v23 = vmul.f32 %v1803_v48, %v633_v37  ;;  %v2260_v28 = vpack.c.bf16 %v1840_v32, %v2259_v55 }
 0x1b9   : > { %v1954_v47 = vpop.permute.xlu1 %704  ;;  %v1956_v44 = vpop.permute.xlu0 %660  ;;  %v1300_v11 = vpack.c.bf16 %v563_v5, %v561_v62  ;;  %v1302_v40 = vpack.c.bf16 %v562_v54, %v560_v24 }
 0x1bb   : > { %1301 = vmatprep.subr.bf16.mxu1 %v1300_v11 }
 0x1bc   : > { %1303 = vmatpush1.bf16.msra.mxu1 %v1302_v40 }
 0x1bd   : > { %v579_v30 = vpop.permute.xlu1 %578  ;;  %1305 = vmatprep.subr.bf16.mxu1 %v2256_v49  ;;  %v669_v51 = vpop.permute.xlu0 %668 }
 0x1be   : > { %v584_v42 = vsel %vm580_vm5, %v1853_v4, %v579_v30  ;;  %v588_v7 = vsel %vm580_vm5, %v579_v30, %v1853_v4  ;;  %v1312_v4 = vpack.c.bf16 %v1554_v29, %v1548_v27  ;;  %v1998_v27 = vrot.slane %v1227_v12, %v1683_v60 }
 0x1bf   : > { %v608_v61 = vmul.f32 %v1756_v36, %v588_v7  ;;  %v609_v17 = vmul.f32 %v1765_v46, %v584_v42  ;;  %v1314_v46 = vpack.c.bf16 %v1526_v21, %v1522_v16  ;;  %v1318_v16 = vpack.c.bf16 %v1578_v35, %v1568_v33 }
 0x1c0   : > { %1307 = vmatpush1.bf16.msra.mxu1 %v2257_v13  ;;  %v629_v21 = vsel %vm626_vm6, %v1855_v8, %v623_v25  ;;  %v2258_v8 = vpack.c.bf16 %v1843_v34, %v1837_v53 }
 0x1c1   : > { %v1980_v15 = vpop.permute.xlu1 %712  ;;  %v1982_v43 = vpop.permute.xlu0 %702  ;;  %v1308_v52 = vpack.c.bf16 %v609_v17, %v607_v41  ;;  %v1310_v0 = vpack.c.bf16 %v608_v61, %v606_v31  ;;  %v652_v26 = vmul.f32 %v1790_v63, %v629_v21  ;;  %v679_v41 = vsel %vm672_vm7, %v669_v51, %v1956_v44 }
 0x1c3   : > { %1309 = vmatprep.subr.bf16.mxu1 %v1308_v52 }
 0x1c4   : > { %1311 = vmatpush1.bf16.msra.mxu1 %v1310_v0 }
 0x1c5   : > { %v751_v1 = vpop.permute.xlu1 %750  ;;  %1313 = vmatprep.subr.bf16.mxu1 %v1312_v4  ;;  %v711_v36 = vpop.permute.xlu0 %710 }
 0x1c6   : > { %v723_v32 = vsel %vm718_vm9, %v711_v36, %v1982_v43  ;;  %v719_v56 = vsel %vm718_vm9, %v1982_v43, %v711_v36 }
 0x1c8   : > { %1315 = vmatpush1.bf16.msra.mxu1 %v1314_v46 }
 0x1c9   : > { %v759_v29 = vpop.permute.xlu1 %758  ;;  %v749_v3 = vpop.permute.xlu0 %748  ;;  %1317 = vmatprep.subr.bf16.mxu1 %v1316_v14 }
 0x1ca   : > { %v766_v39 = vsel %vm764_vm8, %v751_v1, %v759_v29  ;;  %v770_v10 = vsel %vm764_vm8, %v759_v29, %v751_v1 }
 0x1cb   : > { %v788_v33 = vmul.f32 %v1995_v45, %v766_v39  ;;  %v789_v35 = vmul.f32 %v1998_v27, %v770_v10 }
 0x1cc   : > { %1319 = vmatpush1.bf16.msra.mxu1 %v1318_v16 }
 0x1cd   : > { %v625_v24 = vpop.permute.xlu1 %624  ;;  %v757_v62 = vpop.permute.xlu0 %756  ;;  %1321 = vmatprep.subr.bf16.mxu1 %v2258_v8  ;;  %v1045_v8 = vld [vmem:[%s2247_s6 + $0x80] sm:$0xff] }
 0x1ce   : > { %v630_v25 = vsel %vm626_vm6, %v1857_v9, %v625_v24  ;;  %v634_v54 = vsel %vm626_vm6, %v625_v24, %v1857_v9  ;;  %v765_v5 = vsel %vm764_vm8, %v749_v3, %v757_v62  ;;  %v769_v50 = vsel %vm764_vm8, %v757_v62, %v749_v3 }
 0x1cf   : > { %v654_v11 = vmul.f32 %v1790_v63, %v630_v25  ;;  %v655_v40 = vmul.f32 %v1803_v48, %v634_v54  ;;  %v786_v53 = vmul.f32 %v1995_v45, %v765_v5  ;;  %v787_v34 = vmul.f32 %v1998_v27, %v769_v50  ;;  %v1226_v48 = vld [vmem:[%s2246_s5 + $0x7] ss:$8 sm:$0x3] }
 0x1d0   : > { %1323 = vmatpush1.bf16.msra.mxu1 %v2260_v28  ;;  %v675_v63 = vsel %vm672_vm7, %v1956_v44, %v669_v51  ;;  %v737_v17 = vrot.slane %v1226_v48, %v1683_v60  ;;  %v699_v44 = vmul.f32 %v1885_v19, %v679_v41  ;;  %v724_v51 = vsel %vm718_vm9, %v1980_v15, %v1954_v47  ;;  %v1046_v25 = vld [vmem:[%s2247_s6 + $0x88] sm:$0xff]  ;;  %v1029_v28 = vld [vmem:[%s2247_s6] sm:$0xff] }
 0x1d1   : > { %v1346_v30 = vpack.c.bf16 %v788_v33, %v786_v53  ;;  %v709_v9 = vpop.permute.xlu1 %708  ;;  %v707_v49 = vpop.permute.xlu0 %706  ;;  %v1324_v42 = vpack.c.bf16 %v655_v40, %v653_v23  ;;  %v1344_v7 = vpack.c.bf16 %v789_v35, %v787_v34  ;;  %v1326_v31 = vpack.c.bf16 %v654_v11, %v652_v26  ;;  %v798_v34 = vld [vmem:[%s2244_s3 + $0x20] sm:$0xff] }
 0x1d2   : > { %v698_v61 = vmul.f32 %v1878_v22, %v675_v63  ;;  %v741_v6 = vmul.f32 %v737_v17, %v723_v32  ;;  %v733_v1 = vrot.slane %v1226_v48, %v1681_v59  ;;  %v743_v46 = vmul.f32 %v737_v17, %v724_v51  ;;  %v1031_v63 = vld [vmem:[%s2247_s6 + $0x10] sm:$0xff]  ;;  %v1032_v48 = vld [vmem:[%s2247_s6 + $0x18] sm:$0xff]  ;;  %v1049_v41 = vld [vmem:[%s2247_s6 + $0xa0] sm:$0xff] }
 0x1d3   : > { %1325 = vmatprep.subr.bf16.mxu1 %v1324_v42  ;;  %1345 = vmatprep.subr.bf16.mxu0 %v1344_v7  ;;  %v1352_v55 = vpack.c.bf16 %v1046_v25, %v1045_v8  ;;  %v801_v42 = vld [vmem:[%s2244_s3 + $0x38] sm:$0xff]  ;;  %v1050_v32 = vld [vmem:[%s2247_s6 + $0xa8] sm:$0xff] }
 0x1d4   : > { %1327 = vmatpush1.bf16.msra.mxu1 %v1326_v31  ;;  %1347 = vmatpush1.bf16.msra.mxu0 %v1346_v30  ;;  %v740_v29 = vmul.f32 %v733_v1, %v719_v56  ;;  %v1048_v30 = vld [vmem:[%s2247_s6 + $0x98] sm:$0xff]  ;;  %v1360_v51 = vpack.c.bf16 %v1050_v32, %v1049_v41  ;;  %v1051_v56 = vld [vmem:[%s2247_s6 + $0xb0] sm:$0xff] }
 0x1d5   : > { %v671_v13 = vpop.permute.xlu1 %670  ;;  %v715_v52 = vpop.permute.xlu0 %714  ;;  %1329 = vmatprep.subr.bf16.mxu1 %v1328_v18  ;;  %v1044_v8 = vld [vmem:[%s2247_s6 + $0x78] sm:$0xff] }
 0x1d6   : > { %v676_v0 = vsel %vm672_vm7, %v1932_v38, %v671_v13  ;;  %v680_v60 = vsel %vm672_vm7, %v671_v13, %v1932_v38  ;;  %v720_v38 = vsel %vm718_vm9, %v1954_v47, %v1980_v15  ;;  %v721_v59 = vsel %vm718_vm9, %v707_v49, %v715_v52  ;;  %v799_v13 = vld [vmem:[%s2244_s3 + $0x28] sm:$0xff] }
 0x1d7   : > { %v700_v18 = vmul.f32 %v1878_v22, %v676_v0  ;;  %v701_v4 = vmul.f32 %v1885_v19, %v680_v60  ;;  %v1336_v22 = vpack.c.bf16 %v743_v46, %v741_v6  ;;  %v742_v19 = vmul.f32 %v733_v1, %v720_v38  ;;  %v1033_v0 = vld [vmem:[%s2247_s6 + $0x20] sm:$0xff]  ;;  %v1034_v60 = vld [vmem:[%s2247_s6 + $0x28] sm:$0xff]  ;;  %v1052_v6 = vld [vmem:[%s2247_s6 + $0xb8] sm:$0xff] }
 0x1d8   : > { %1331 = vmatpush1.bf16.msra.mxu1 %v1330_v2  ;;  %v725_v20 = vsel %vm718_vm9, %v715_v52, %v707_v49  ;;  %v744_v16 = vmul.f32 %v733_v1, %v721_v59  ;;  %v796_v49 = vld [vmem:[%s2244_s3 + $0x10] sm:$0xff]  ;;  %v1364_v38 = vpack.c.bf16 %v1052_v6, %v1051_v56  ;;  %v1038_v59 = vld [vmem:[%s2247_s6 + $0x48] sm:$0xff] }
 0x1d9   : > { %v755_v12 = vpop.permute.xlu1 %754  ;;  %v753_v14 = vpop.permute.xlu0 %752  ;;  %v1332_v43 = vpack.c.bf16 %v701_v4, %v699_v44  ;;  %v1334_v36 = vpack.c.bf16 %v700_v18, %v698_v61  ;;  %v1338_v3 = vpack.c.bf16 %v742_v19, %v740_v29  ;;  %v745_v21 = vmul.f32 %v737_v17, %v725_v20  ;;  %v804_v52 = vld [vmem:[%s2244_s3 + $0x50] sm:$0xff]  ;;  %v803_v18 = vld [vmem:[%s2244_s3 + $0x48] sm:$0xff]  ;;  %v802_v4 = vld [vmem:[%s2244_s3 + $0x40] sm:$0xff] }
 0x1da   : > { %v2261_v61 = vmov 0.0   ;;  %v1358_v44 = vpack.c.bf16 %v1032_v48, %v1031_v63  ;;  %v1035_v46 = vld [vmem:[%s2247_s6 + $0x30] sm:$0xff]  ;;  %v1037_v19 = vld [vmem:[%s2247_s6 + $0x40] sm:$0xff] }
 0x1db   : > { %1333 = vmatprep.subr.bf16.mxu1 %v1332_v43  ;;  %v1054_v43 = vld [vmem:[%s2247_s6 + $0xc8] sm:$0xff]  ;;  %v1055_v20 = vld [vmem:[%s2247_s6 + $0xd0] sm:$0xff] }
 0x1dc   : > { %1335 = vmatpush1.bf16.msra.mxu1 %v1334_v36  ;;  %v805_v36 = vld [vmem:[%s2244_s3 + $0x58] sm:$0xff] }
 0x1dd   : > { %v717_v57 = vpop.permute.xlu1 %716  ;;  %v761_v2 = vpop.permute.xlu0 %760  ;;  %1337 = vmatprep.subr.bf16.mxu1 %v1336_v22 }
 0x1de   : > { %v722_v47 = vsel %vm718_vm9, %v709_v9, %v717_v57  ;;  %v726_v15 = vsel %vm718_vm9, %v717_v57, %v709_v9  ;;  %v767_v10 = vsel %vm764_vm8, %v753_v14, %v761_v2  ;;  %v771_v26 = vsel %vm764_vm8, %v761_v2, %v753_v14  ;;  %v797_v9 = vld [vmem:[%s2244_s3 + $0x18] sm:$0xff]  ;;  %v1053_v14 = vld [vmem:[%s2247_s6 + $0xc0] sm:$0xff] }
 0x1df   : > { %v746_v37 = vmul.f32 %v733_v1, %v722_v47  ;;  %v747_v39 = vmul.f32 %v737_v17, %v726_v15  ;;  %v790_v54 = vmul.f32 %v1995_v45, %v767_v10  ;;  %v791_v5 = vmul.f32 %v1998_v27, %v771_v26  ;;  %v800_v17 = vld [vmem:[%s2244_s3 + $0x30] sm:$0xff]  ;;  %v1056_v57 = vld [vmem:[%s2247_s6 + $0xd8] sm:$0xff]  ;;  %v1041_v10 = vld [vmem:[%s2247_s6 + $0x60] sm:$0xff] }
 0x1e0   : > { %1339 = vmatpush1.bf16.msra.mxu1 %v1338_v3  ;;  %v1362_v1 = vpack.c.bf16 %v1034_v60, %v1033_v0  ;;  %v1368_v22 = vpack.c.bf16 %v1054_v43, %v1053_v14  ;;  %v1370_v2 = vpack.c.bf16 %v1038_v59, %v1037_v19  ;;  %v1372_v47 = vpack.c.bf16 %v1056_v57, %v1055_v20  ;;  %v1039_v15 = vld [vmem:[%s2247_s6 + $0x50] sm:$0xff]  ;;  %v1040_v3 = vld [vmem:[%s2247_s6 + $0x58] sm:$0xff]  ;;  %v1042_v26 = vld [vmem:[%s2247_s6 + $0x68] sm:$0xff] }
 0x1e1   : > { %v763_v23 = vpop.permute.xlu1 %762  ;;  %v1340_v33 = vpack.c.bf16 %v747_v39, %v745_v21  ;;  %v1342_v35 = vpack.c.bf16 %v746_v37, %v744_v16  ;;  %v1374_v16 = vpack.c.bf16 %v1040_v3, %v1039_v15  ;;  %v1057_v21 = vld [vmem:[%s2247_s6 + $0xe0] sm:$0xff]  ;;  %v1058_v37 = vld [vmem:[%s2247_s6 + $0xe8] sm:$0xff] }
 0x1e2   : > { %v768_v24 = vsel %vm764_vm8, %v755_v12, %v763_v23  ;;  %v772_v62 = vsel %vm764_vm8, %v763_v23, %v755_v12  ;;  %v1036_v12 = vld [vmem:[%s2247_s6 + $0x38] sm:$0xff]  ;;  %v1376_v39 = vpack.c.bf16 %v1058_v37, %v1057_v21  ;;  %v1378_v23 = vpack.c.bf16 %v1042_v26, %v1041_v10 }
 0x1e3   : > { %v792_v50 = vmul.f32 %v1995_v45, %v768_v24  ;;  %v793_v11 = vmul.f32 %v1998_v27, %v772_v62  ;;  %1341 = vmatprep.subr.bf16.mxu1 %v1340_v33  ;;  %v1030_v45 = vld [vmem:[%s2247_s6 + $0x8] sm:$0xff]  ;;  %v1047_v27 = vld [vmem:[%s2247_s6 + $0x90] sm:$0xff]  ;;  %v1366_v29 = vpack.c.bf16 %v1036_v12, %v1035_v46 }
 0x1e4   : > { %1343 = vmatpush1.bf16.msra.mxu1 %v1342_v35  ;;  %v1354_v7 = vpack.c.bf16 %v1030_v45, %v1029_v28  ;;  %v1356_v31 = vpack.c.bf16 %v1048_v30, %v1047_v27  ;;  %v1059_v33 = vld [vmem:[%s2247_s6 + $0xf0] sm:$0xff]  ;;  %v1060_v35 = vld [vmem:[%s2247_s6 + $0xf8] sm:$0xff] }
 0x1e5   : > { %v1350_v40 = vpack.c.bf16 %v792_v50, %v790_v54  ;;  %v1348_v53 = vpack.c.bf16 %v793_v11, %v791_v5  ;;  %v1380_v24 = vpack.c.bf16 %v1060_v35, %v1059_v33  ;;  %v1043_v62 = vld [vmem:[%s2247_s6 + $0x70] sm:$0xff] }
 0x1e6   : > { %v1382_v25 = vpack.c.bf16 %v1044_v8, %v1043_v62 }
 0x1e7   : > { %908 = vmatmul.mubr.f32.vlgmr.msra.gmra.mrb[0].mxu1 %v794_v58  ;;  %1349 = vmatprep.subr.bf16.mxu0 %v1348_v53 }
 0x1e8   : > { %1351 = vmatpush1.bf16.msra.mxu0 %v1350_v40  ;;  %913 = vmatprep.mubr.f32.mxu1 %v798_v34 }
 0x1e9   : > { %1353 = vmatprep.subr.bf16.mxu0 %v1352_v55 }
 0x1eb   : > { %914 = vmatmul.mubr.f32.gmra.mrb[2].mxu1 %v797_v9  ;;  %1228 = vmatmul.mubr.msk.f32.vlgmr.msra.gmra.mrb[8].mxu0 %vm830_vm10, %v796_v49 }
 0x1ec   : > { %1002 = vmatprep.mubr.f32.mxu0 %v2261_v61  ;;  %919 = vmatprep.mubr.f32.mxu1 %v801_v42 }
 0x1ed   : > { %1355 = vmatpush3.bf16.msra.mxu0 %v1354_v7 }
 0x1ee   : > { %1357 = vmatprep.subr.bf16.mxu0 %v1356_v31  ;;  %v813_v50 = vpop.permute.xlu0 %812 }
 0x1ef   : > { %920 = vmatmul.mubr.f32.gmra.mrb[4].mxu1 %v800_v17  ;;  %1229 = vmatmul.mubr.msk.f32.gmra.mrb[10].mxu0 %vm830_vm10, %v799_v13 }
 0x1f0   : > { %1008 = vmatprep.mubr.f32.mxu0 %v2261_v61  ;;  %925 = vmatprep.mubr.f32.mxu1 %v804_v52 }
 0x1f1   : > { %1359 = vmatpush3.bf16.msra.mxu0 %v1358_v44 }
 0x1f2   : > { %1361 = vmatprep.subr.bf16.mxu0 %v1360_v51  ;;  %v818_v45 = vpop.permute.xlu1 %817  ;;  %v823_v32 = vpop.permute.xlu0 %822 }
 0x1f3   : > { %926 = vmatmul.mubr.f32.gmra.mrb[6].mxu1 %v803_v18  ;;  %1230 = vmatmul.mubr.msk.f32.gmra.mrb[12].mxu0 %vm830_vm10, %v802_v4 }
 0x1f4   : > { %1014 = vmatprep.mubr.f32.mxu0 %v2261_v61 }
 0x1f5   : > { %1363 = vmatpush3.bf16.msra.mxu0 %v1362_v1 }
 0x1f6   : > { %1365 = vmatprep.subr.bf16.mxu0 %v1364_v38  ;;  %v828_v18 = vpop.permute.xlu1 %827 }
 0x1f7   : > { %1231 = vmatmul.mubr.msk.f32.gmra.mrb[14].mxu0 %vm830_vm10, %v805_v36 }
 0x1f9   : > { %1367 = vmatpush3.bf16.msra.mxu0 %v1366_v29 }
 0x1fa   : > { %1369 = vmatprep.subr.bf16.mxu0 %v1368_v22 }
 0x1fd   : > { %1371 = vmatpush3.bf16.msra.mxu0 %v1370_v2 }
 0x1fe   : > { %1373 = vmatprep.subr.bf16.mxu0 %v1372_v47 }
 0x201   : > { %1375 = vmatpush3.bf16.msra.mxu0 %v1374_v16 }
 0x202   : > { %1377 = vmatprep.subr.bf16.mxu0 %v1376_v39 }
 0x205   : > { %1379 = vmatpush3.bf16.msra.mxu0 %v1378_v23 }
 0x206   : > { %1381 = vmatprep.subr.bf16.mxu0 %v1380_v24 }
 0x209   : > { %1383 = vmatpush3.bf16.msra.mxu0 %v1382_v25 }
 0x2ba   : > { %v909_v54 = vpop.f32.mrb[0].mxu1 }
 0x2bb   : > { %v911_v5 = vpop.f32.mrb[1].mxu1  ;;  %v910_v11 = vadd.f32 %v909_v54, %v813_v50 }
 0x2bc   : > { %v912_v58 = vadd.f32 %v911_v5, %v813_v50 }
 0x2be   : > { %v915_v40 = vpop.f32.mrb[2].mxu1  ;;  %v998_v53 = vpop.f32.mrb[8].mxu0 }
 0x2bf   : > { %v999_v34 = vadd.f32 %v998_v53, %v910_v11  ;;  %v917_v55 = vpop.f32.mrb[3].mxu1  ;;  %v1000_v28 = vpop.f32.mrb[9].mxu0  ;;  %v916_v30 = vadd.f32 %v915_v40, %v818_v45 }
 0x2c0   : > { %v1001_v27 = vadd.f32 %v1000_v28, %v912_v58  ;;  %v918_v9 = vadd.f32 %v917_v55, %v818_v45 }
 0x2c1   : > { %v1021_v31 = vmax.f32 %v999_v34, 0.0 }
 0x2c2   : > { %v1022_v49 = vmax.f32 %v1001_v27, 0.0  ;;  %v921_v42 = vpop.f32.mrb[4].mxu1  ;;  %v1004_v7 = vpop.f32.mrb[10].mxu0 }
 0x2c3   : > { %v1005_v63 = vadd.f32 %v1004_v7, %v916_v30  ;;  %v923_v48 = vpop.f32.mrb[5].mxu1  ;;  %v1006_v41 = vpop.f32.mrb[11].mxu0  ;;  %v922_v17 = vadd.f32 %v921_v42, %v823_v32 }
 0x2c4   : > { %v1007_v61 = vadd.f32 %v1006_v41, %v918_v9  ;;  %1125 = vmatprep.mubr.f32.mxu0 %v1022_v49  ;;  %v924_v13 = vadd.f32 %v923_v48, %v823_v32 }
 0x2c5   : > { %1126 = vmatmul.mubr.f32.vlgmr.msra.gmra.mrb[16].mxu0 %v1021_v31  ;;  %v1023_v0 = vmax.f32 %v1005_v63, 0.0 }
 0x2c6   : > { %v1024_v52 = vmax.f32 %v1007_v61, 0.0  ;;  %v927_v44 = vpop.f32.mrb[6].mxu1  ;;  %v1010_v51 = vpop.f32.mrb[12].mxu0 }
 0x2c7   : > { %v1011_v60 = vadd.f32 %v1010_v51, %v922_v17  ;;  %v929_v56 = vpop.f32.mrb[7].mxu1  ;;  %v1012_v6 = vpop.f32.mrb[13].mxu0  ;;  %v928_v1 = vadd.f32 %v927_v44, %v828_v18 }
 0x2c8   : > { %v1013_v4 = vadd.f32 %v1012_v6, %v924_v13  ;;  %1130 = vmatprep.mubr.f32.mxu0 %v1024_v52  ;;  %v930_v38 = vadd.f32 %v929_v56, %v828_v18 }
 0x2c9   : > { %1131 = vmatmul.mubr.f32.gmra.mrb[18].mxu0 %v1023_v0  ;;  %v1025_v14 = vmax.f32 %v1011_v60, 0.0 }
 0x2ca   : > { %v1026_v46 = vmax.f32 %v1013_v4, 0.0  ;;  %v1016_v12 = vpop.f32.mrb[14].mxu0 }
 0x2cb   : > { %v1017_v43 = vadd.f32 %v1016_v12, %v928_v1  ;;  %v1018_v36 = vpop.f32.mrb[15].mxu0 }
 0x2cc   : > { %v1019_v29 = vadd.f32 %v1018_v36, %v930_v38  ;;  %1135 = vmatprep.mubr.f32.mxu0 %v1026_v46 }
 0x2cd   : > { %1136 = vmatmul.mubr.f32.gmra.mrb[20].mxu0 %v1025_v14  ;;  %v1027_v19 = vmax.f32 %v1017_v43, 0.0 }
 0x2ce   : > { %v1028_v22 = vmax.f32 %v1019_v29, 0.0 }
 0x2d0   : > { %1140 = vmatprep.mubr.f32.mxu0 %v1028_v22 }
 0x2d1   : > { %1141 = vmatmul.mubr.f32.gmra.mrb[22].mxu0 %v1027_v19 }
 0x398   : > { %v1268_v59 = vpop.f32.mrb[16].mxu0 }
 0x399   : > { %v1269_v20 = vpop.f32.mrb[17].mxu0 }
 0x39a   : > { %v1270_v57 = vadd.f32 %v1269_v20, %v1268_v59 }
 0x39c   : > { %1147 = vst.msk [vmem:[%s278_s20] sm:$0xff] %vm1146_vm11, %v1270_v57  ;;  %v1271_v2 = vpop.f32.mrb[18].mxu0 }
 0x39d   : > { %v1272_v47 = vpop.f32.mrb[19].mxu0 }
 0x39e   : > { %v1273_v15 = vadd.f32 %v1272_v47, %v1271_v2 }
 0x3a0   : > { %1148 = vst.msk [vmem:[%s278_s20 + $0x8] sm:$0xff] %vm1146_vm11, %v1273_v15  ;;  %v1274_v3 = vpop.f32.mrb[20].mxu0 }
 0x3a1   : > { %v1275_v16 = vpop.f32.mrb[21].mxu0 }
 0x3a2   : > { %v1276_v21 = vadd.f32 %v1275_v16, %v1274_v3 }
 0x3a4   : > { %1149 = vst.msk [vmem:[%s278_s20 + $0x10] sm:$0xff] %vm1146_vm11, %v1276_v21  ;;  %v1277_v37 = vpop.f32.mrb[22].mxu0 }
 0x3a5   : > { %v1278_v39 = vpop.f32.mrb[23].mxu0 }
 0x3a6   : > { %v1279_v10 = vadd.f32 %v1278_v39, %v1277_v37 }
 0x3a8   : > { %1150 = vst.msk [vmem:[%s278_s20 + $0x18] sm:$0xff] %vm1146_vm11, %v1279_v10 }
 0x3a9 PF: > { %s17_s24 = sadd.s32 1, %s1427_s24  }
 0x3aa   : > { %p14_p4 = scmp.ge.s32.totalorder %s17_s24, 4  }
 0x3ac   :  { %16 = sbr.rel (!%p14_p4) target bundleno = 1 (0x1), region = 85 }

</bundles_post_ra>
